<compile_context>
chip_gen: v7x
topology: tpu7x:2x2x1
jax: 0.10.0
libtpu: 0.0.40
codegen_flags: <defaults>
</compile_context>

<pallas_src>
import jax
import jax.numpy as jnp
from jax.experimental import pallas as pl
from jax.experimental.pallas import tpu as pltpu

_LANES = 128
_TINY_BYTES = 128 * 1024  # below this, use the single-block (no-grid) path


def _build_encoding(max_len: int, d_model: int, dtype=jnp.float32) -> jnp.ndarray:
    """Replicates PositionalEncoding.__init__ (deterministic, no params)."""
    pos = jnp.arange(max_len, dtype=jnp.float32)[:, None]              # (max_len, 1)
    two_i = jnp.arange(0, d_model, 2, dtype=jnp.float32)               # (ceil(D/2),)
    angles = pos / jnp.power(10000.0, two_i / float(d_model))          # (max_len, ceil(D/2))
    enc = jnp.zeros((max_len, d_model), dtype=jnp.float32)
    enc = enc.at[:, 0::2].set(jnp.sin(angles))
    enc = enc.at[:, 1::2].set(jnp.cos(angles[:, : d_model // 2]))
    return enc.astype(dtype)


def _sublane_multiple(dtype) -> int:
    # 8 for 4-byte dtypes, 16 for bf16, 32 for int8/fp8 (packed sublanes).
    return max(8, 32 // jnp.dtype(dtype).itemsize)


def _chip_params():
    """Per-generation (per-buffer tile byte target, scoped VMEM limit)."""
    try:
        kind = jax.devices()[0].device_kind.lower()
    except Exception:
        kind = ""
    if "v7" in kind:
        return 4 << 20, 32 << 20    # 64 MiB physical VMEM/TC: big tiles, keep headroom
    if "v6" in kind:
        return 6 << 20, 64 << 20    # 128 MiB physical VMEM: free headroom
    return 2 << 20, 32 << 20        # v5e & default: ~2 MiB tiles already near roofline


def _fold_or_pad(S: int, D: int):
    """Return (rs, pad_cols) making rs*(D+pad) a multiple of 128 (lane-dense).

    Prefers a fold (no extra bytes); pads only if padding <= D (<= 2x traffic);
    in the rare tiny-odd-D case accepts a non-lane-dense (masked) layout.
    """
    if D % _LANES == 0:
        return 1, 0
    for rs in range(2, S + 1):
        if S % rs == 0 and (rs * D) % _LANES == 0:
            return rs, 0
    pad = (-D) % _LANES
    if pad <= D:
        return 1, pad
    return 1, 0


def _choose_tiles(S_f: int, W: int, itemsize: int, sub: int, target_bytes: int):
    """Pick (sublane_tile, lane_tile): maximize lanes first, then fill sublanes."""
    if W % _LANES == 0:
        td_max = max(_LANES, (target_bytes // (sub * itemsize)) // _LANES * _LANES)
        td = min(W, td_max)
    else:
        td = W  # non-lane-dense fallback only for tiny odd D (< 64 cols)
    ts = max(sub, (target_bytes // (td * itemsize)) // sub * sub)
    if ts >= S_f:
        ts = S_f  # full extent is always a legal block dim
    return ts, td


def _add_pe_tile_kernel(x_ref, pe_ref, o_ref):
    # (ts, td) VMEM blocks: one clean VPU add; promotion in-register, cast on store.
    o_ref[...] = (x_ref[...] + pe_ref[...]).astype(o_ref.dtype)


def _add_pe_full_kernel(x_ref, pe_ref, o_ref):
    # Tiny path: x/o are (B, S, D), pe is (S, D); single full-extent block.
    o_ref[...] = (x_ref[...] + pe_ref[...][None, :, :]).astype(o_ref.dtype)


def positional_encoding_forward(x: jnp.ndarray, encoding: jnp.ndarray, *,
                                donate_x: bool = False) -> jnp.ndarray:
    """x: (B, S, D); encoding: (max_len, D). Returns x + encoding[:S] (broadcast over B).

    Set donate_x=True only when x is actually donated to the computation; otherwise
    aliasing would force XLA to insert a defensive copy (extra full HBM pass).
    """
    B, S, D = x.shape
    if S > encoding.shape[0]:
        raise ValueError(f"seq_len={S} exceeds max_len={encoding.shape[0]}")

    pe = encoding[:S, :]                                  # keep PE in its own dtype (f32)
    out_dtype = jnp.promote_types(x.dtype, pe.dtype)      # PyTorch promotion semantics
    itemsize = max(jnp.dtype(x.dtype).itemsize,
                   jnp.dtype(pe.dtype).itemsize,
                   jnp.dtype(out_dtype).itemsize)

    # ---- tiny path: single VMEM block, no grid / pipeline overhead ----
    if B * S * D * itemsize <= _TINY_BYTES:
        return pl.pallas_call(
            _add_pe_full_kernel,
            out_shape=jax.ShapeDtypeStruct((B, S, D), out_dtype),
        )(x, pe)

    target_bytes, vmem_limit = _chip_params()

    # ---- fold / pad so the last (lane) dim is a multiple of 128 ----
    rs, pad = _fold_or_pad(S, D)
    Dp = D + pad
    if pad:
        x = jnp.pad(x, ((0, 0), (0, 0), (0, pad)))
        pe = jnp.pad(pe, ((0, 0), (0, pad)))
    S_f, W = S // rs, rs * Dp
    x3 = x.reshape(B, S_f, W)
    pe2 = pe.reshape(S_f, W)

    sub = max(_sublane_multiple(x.dtype), _sublane_multiple(pe.dtype),
              _sublane_multiple(out_dtype))
    ts, td = _choose_tiles(S_f, W, itemsize, sub, target_bytes)
    gs, gd = pl.cdiv(S_f, ts), pl.cdiv(W, td)

    # Alias only when it can be a true in-place add (caller donates, no pad, same dtype).
    alias = {0: 0} if (donate_x and pad == 0 and out_dtype == x.dtype) else {}

    if gs == 1 and gd == 1:
        # Degenerate (seq, lane) grid: split the batch across cores instead.
        grid = (B,)
        in_specs = [pl.BlockSpec((None, S_f, W), lambda b: (b, 0, 0)),
                    pl.BlockSpec((S_f, W), lambda b: (0, 0))]
        out_spec = pl.BlockSpec((None, S_f, W), lambda b: (b, 0, 0))
        semantics = ("parallel",)
    else:
        # Batch innermost: shared PE block index constant across consecutive steps,
        # so its DMA is not re-issued per batch element.
        grid = (gs, gd, B)
        in_specs = [pl.BlockSpec((None, ts, td), lambda s, d, b: (b, s, d)),
                    pl.BlockSpec((ts, td), lambda s, d, b: (s, d))]
        out_spec = pl.BlockSpec((None, ts, td), lambda s, d, b: (b, s, d))
        semantics = ("parallel", "parallel", "parallel")

    out3 = pl.pallas_call(
        _add_pe_tile_kernel,
        out_shape=jax.ShapeDtypeStruct((B, S_f, W), out_dtype),
        grid_spec=pltpu.PrefetchScalarGridSpec(
            num_scalar_prefetch=0,
            grid=grid,
            in_specs=in_specs,
            out_specs=out_spec,
        ),
        input_output_aliases=alias,
        compiler_params=pltpu.CompilerParams(
            dimension_semantics=semantics,
            vmem_limit_bytes=vmem_limit,
        ),
    )(x3, pe2)

    out = out3.reshape(B, S, Dp)
    if pad:
        out = out[:, :, :D]
    return out


if __name__ == "__main__":
    # Small shapes consistent with the module's forward (exercises the tiny path).
    batch, seq_len, d_model, max_len = 2, 8, 32, 16
    key = jax.random.PRNGKey(0)
    x = jax.random.normal(key, (batch, seq_len, d_model), dtype=jnp.float32)
    encoding = _build_encoding(max_len, d_model, dtype=jnp.float32)
    ref = x + encoding[:seq_len, :][None, :, :]

    fwd = jax.jit(positional_encoding_forward)
    out = jax.block_until_ready(fwd(x, encoding))
    assert out.shape == x.shape and out.dtype == ref.dtype
    assert jnp.allclose(out, ref, atol=1e-6), "tiny-path mismatch vs reference"

    # Exercise the tiled (multi-block, batch-innermost) path.
    x_big = jax.random.normal(jax.random.PRNGKey(0), (2, 8192, 512), dtype=jnp.float32)
    enc_big = _build_encoding(8192, 512, dtype=jnp.float32)
    ref_big = x_big + enc_big[None, :, :]
    out_big = jax.block_until_ready(fwd(x_big, enc_big))
    assert jnp.allclose(out_big, ref_big, atol=1e-6), "tiled-path mismatch vs reference"

    # Exercise the lane-padding fallback (d_model not foldable to a multiple of 128).
    x_odd = jax.random.normal(jax.random.PRNGKey(0), (2, 600, 100), dtype=jnp.float32)
    enc_odd = _build_encoding(600, 100, dtype=jnp.float32)
    ref_odd = x_odd + enc_odd[None, :, :]
    out_odd = jax.block_until_ready(fwd(x_odd, enc_odd))
    assert jnp.allclose(out_odd, ref_odd, atol=1e-6), "padded-path mismatch vs reference"

    print("KERNEL_OK")
</pallas_src>

<mosaic_0001>
module attributes {stable_mosaic.version = 11 : i64} {
  func.func @_add_pe_full_kernel(%arg0: memref<2x8x32xf32, #tpu.memory_space<vmem>>, %arg1: memref<8x32xf32, #tpu.memory_space<vmem>>, %arg2: memref<2x8x32xf32, #tpu.memory_space<vmem>>) attributes {dimension_semantics = [], scalar_prefetch = 0 : i64, scratch_operands = 0 : i64, tpu.core_type = #tpu.core_type<tc>} {
    %c0 = arith.constant 0 : index
    %c0_0 = arith.constant 0 : index
    %c0_1 = arith.constant 0 : index
    %0 = vector.load %arg0[%c0, %c0_0, %c0_1] : memref<2x8x32xf32, #tpu.memory_space<vmem>>, vector<2x8x32xf32>
    %c0_2 = arith.constant 0 : index
    %c0_3 = arith.constant 0 : index
    %1 = vector.load %arg1[%c0_2, %c0_3] : memref<8x32xf32, #tpu.memory_space<vmem>>, vector<8x32xf32>
    %2 = vector.shape_cast %1 : vector<8x32xf32> to vector<1x8x32xf32>
    %3 = vector.broadcast %2 : vector<1x8x32xf32> to vector<2x8x32xf32>
    %4 = arith.addf %0, %3 : vector<2x8x32xf32>
    %c0_4 = arith.constant 0 : index
    %c0_5 = arith.constant 0 : index
    %c0_6 = arith.constant 0 : index
    %5 = vector.load %arg2[%c0_4, %c0_5, %c0_6] : memref<2x8x32xf32, #tpu.memory_space<vmem>>, vector<2x8x32xf32>
    tpu.vector_store %arg2[%c0_4, %c0_5, %c0_6], %4 {strides = array<i32>} : memref<2x8x32xf32, #tpu.memory_space<vmem>>, vector<2x8x32xf32>,
    return
  }
}

</mosaic_0001>

<bundles_post_ra>
// kernel: positional_encoding_forward.1
= control target key start
LH: loop header
LB: loop body
LE: loop exit
PB: predicated region body
PF: predicated region fallthrough
CT: control target
= control target key end

     0   :  { %7 = vsyncpa [#allocation3], 0  ;;  %s155_s0 = inlined_call_operand.hbm [shape: f32[2,8,32], index: 0, kind: input, shape index: {}]   ;;  %s156_s1 = inlined_call_operand.vmem [shape: f32[8,32], index: 1, kind: input, shape index: {}]   ;;  %s157_s2 = inlined_call_operand.hbm [shape: f32[2,8,32], index: 2, kind: output, shape index: {}]  }
   0x1   :  { %8 = vsyncpa [#allocation4], 0  ;;  %s103_s9 = smov [#allocation2]   ;;  %s55_s13 = scalar_lea.hbm %s155_s0, 256 }
   0x2   :  { %s14_s10 = sshll.u32 %s103_s9, 4  ;;  %p56_p0 = scmp.ne.s32.totalorder %s155_s0, %s55_s13  ;;  %s15_s10 = int_to_ptr.vmem [resolvable:$true] %s14_s10 }
   0x3   :  { %p59_p1 = scmp.lt.u32.totalorder %s55_s13, %s155_s0 }
   0x5   :  { %p61_p2 = pnand %p59_p1, %p56_p0 }
   0x7   :  { %64 = shalt.err (!%p61_p2)
}
   0x8   :  { %s65_s18 = scalar_lea.vmem %s15_s10, 256  ;;  %p70_p4 = scmp.lt.s32.totalorder %s15_s10, %s15_s10 }
   0x9   :  { %p66_p3 = scmp.ne.s32.totalorder %s15_s10, %s65_s18  ;;  %p71_p5 = scmp.lt.s32.totalorder %s65_s18, %s65_s18 }
   0xb   :  { %p72_p6 = por %p71_p5, %p70_p4 }
   0xd   :  { %p73_p7 = pnand %p72_p6, %p66_p3 }
   0xf   :  { %76 = shalt.err (!%p73_p7)
}
  0x10   :  { %s104_s19 = smov 128   ;;  %s105_s20 = smov 8  }
  0x11   :  { %20 = dma.hbm_to_vmem [thread:$0]  %s155_s0, 256, %s15_s10, [#allocation3], %s104_s19, %s104_s19, %s105_s20  }
  0x12   :  { %99 = dma.done.wait [#allocation3], 256  }
  0x13   :  { %100 = vsyncadd [#allocation3], 4294967040  ;;  %s106_s23 = smov [#allocation5]   ;;  %v26_v0 = vld [vmem:[#allocation2] sm:$0xff]  ;;  %vm31_vm0 = vcmask 261120   ;;  %v27_v2 = vld [vmem:[#allocation2 + $0x8] sm:$0xff] }
  0x14   :  { %s39_s24 = sshll.u32 %s106_s23, 4  ;;  %v28_v1 = vld [vmem:[%s156_s1] sm:$0xff]  ;;  %s40_s24 = int_to_ptr.vmem [resolvable:$true] %s39_s24 }
  0x15   :  { %v29_v3 = vadd.f32 %v28_v1, %v26_v0  ;;  %v30_v4 = vadd.f32 %v28_v1, %v27_v2  ;;  %s77_s27 = scalar_lea.vmem %s40_s24, 256  ;;  %p82_p9 = scmp.lt.s32.totalorder %s40_s24, %s40_s24 }
  0x16   :  { %p78_p8 = scmp.ne.s32.totalorder %s40_s24, %s77_s27  ;;  %p83_p10 = scmp.lt.s32.totalorder %s77_s27, %s77_s27 }
  0x17   :  { %32 = vst.msk [vmem:[#allocation5] sm:$0xff] %vm31_vm0, %v29_v3  ;;  %33 = vst.msk [vmem:[#allocation5 + $0x8] sm:$0xff] %vm31_vm0, %v30_v4 }
  0x18   :  { %p84_p11 = por %p83_p10, %p82_p9 }
  0x1a   :  { %p85_p12 = pnand %p84_p11, %p78_p8 }
  0x1c   :  { %88 = shalt.err (!%p85_p12)
}
  0x1d   :  { %s89_s29 = scalar_lea.hbm %s157_s2, 256 }
  0x1e   :  { %p90_p13 = scmp.ne.s32.totalorder %s157_s2, %s89_s29  ;;  %p93_p0 = scmp.lt.u32.totalorder %s89_s29, %s157_s2 }
  0x20   :  { %p95_p1 = pnand %p93_p0, %p90_p13 }
  0x22   :  { %98 = shalt.err (!%p95_p1)
}
  0x23   :  { %45 = dma.vmem_to_hbm [thread:$0]  %s40_s24, 256, %s157_s2, [#allocation4], %s104_s19, %s104_s19, %s105_s20  }
  0x24   :  { %101 = dma.done.wait [#allocation4], 256  }
  0x25   :  { %102 = vsyncadd [#allocation4], 4294967040 }
  0x26   :  { %49 = vsyncpa [#allocation3], 1 }
  0x27   :  { %50 = vsyncpa [#allocation4], 1 }

</bundles_post_ra>
